<compile_context>
chip_gen: v7x
topology: tpu7x:2x2x1
jax: 0.10.0
libtpu: 0.0.40
codegen_flags: <defaults>
</compile_context>

<pallas_src>
import jax
import jax.numpy as jnp
import numpy as np
from jax.experimental import pallas as pl
from jax.experimental.pallas import tpu as pltpu


# ----------------------------------------------------------------------------
# Pallas kernels: (bf16 matmul, f32 acc) + bias (+ residual) (+ ReLU)
# ----------------------------------------------------------------------------
def _make_kernel_single(use_res: bool, use_relu: bool):
    """Full-K-resident variant: one MXU pass, epilogue straight to out_ref."""
    def kernel(*refs):
        if use_res:
            p_ref, w_ref, bias_ref, res_ref, out_ref = refs
        else:
            p_ref, w_ref, bias_ref, out_ref = refs
            res_ref = None
        y = jnp.dot(p_ref[...], w_ref[...], preferred_element_type=jnp.float32)
        y = y + bias_ref[...]
        if use_res:
            y = y + res_ref[...].astype(jnp.float32)
        if use_relu:
            y = jnp.maximum(y, 0.0)
        out_ref[...] = y.astype(out_ref.dtype)
    return kernel


def _make_kernel_kloop(use_res: bool, use_relu: bool):
    """K-tiled variant: f32 VMEM accumulator + pl.when init/finalize."""
    def kernel(*refs):
        if use_res:
            p_ref, w_ref, bias_ref, res_ref, out_ref, acc_ref = refs
        else:
            p_ref, w_ref, bias_ref, out_ref, acc_ref = refs
            res_ref = None
        k = pl.program_id(1)

        @pl.when(k == 0)
        def _():
            acc_ref[...] = jnp.zeros_like(acc_ref)

        acc_ref[...] += jnp.dot(p_ref[...], w_ref[...],
                                preferred_element_type=jnp.float32)

        @pl.when(k == pl.num_programs(1) - 1)
        def _():
            y = acc_ref[...] + bias_ref[...]
            if use_res:
                y = y + res_ref[...].astype(jnp.float32)
            if use_relu:
                y = jnp.maximum(y, 0.0)
            out_ref[...] = y.astype(out_ref.dtype)
    return kernel


# ----------------------------------------------------------------------------
# Tiling heuristics
# ----------------------------------------------------------------------------
def _round_up(x, m):
    return ((x + m - 1) // m) * m


def _pick_m_tile(M):
    """Largest M tile (up to 1024) that divides M while leaving >= 2 grid
    steps on the 'parallel' axis (v7x has 2 TensorCores); a single padded
    tile otherwise (tiny layers)."""
    Mp = _round_up(max(M, 16), 16)
    for tm in (1024, 512, 256, 128, 64):
        if Mp % tm == 0 and Mp // tm >= 2:
            return tm, Mp
    if Mp <= 1024:
        return Mp, Mp
    tm = 512
    return tm, _round_up(Mp, tm)


_MAX_K_FULL = 4608        # 9*512: full-K residency for ResNet-CIFAR layers
_TK_TILED = 2304          # multiple of 256 (v6e/v7x MXU depth) when K tiled
_VMEM_BUDGET = 44 * 2 ** 20      # keep working set under v7x's 64 MiB VMEM
_VMEM_LIMIT_CAP = 48 * 2 ** 20
_VMEM_LIMIT_FLOOR = 16 * 2 ** 20


def _pick_k_tile(K):
    if K <= _MAX_K_FULL:
        return K, K
    return _TK_TILED, _round_up(K, _TK_TILED)


def _to_padded(res, Mp, Coutp):
    """Bring a residual array to the padded (Mp, Coutp) layout; no-op (view)
    when it is already padded (shortcut-conv handoff)."""
    r, c = res.shape
    if (r, c) == (Mp, Coutp):
        return res
    res = res[:min(r, Mp), :min(c, Coutp)]
    return jnp.pad(res, ((0, Mp - res.shape[0]), (0, Coutp - res.shape[1])))


# ----------------------------------------------------------------------------
# Fused (patches @ W) + bias (+ residual) (+ ReLU)
# ----------------------------------------------------------------------------
def fused_matmul_bn(patches, w_mat, bias, residual=None, relu=True,
                    out_dtype=jnp.float32, return_padded=False):
    """out = relu?((patches @ w_mat) + bias (+ residual)).

    `w_mat` is expected to already have the BN scale folded in.
    patches: [M, K] (cast to bf16), w_mat: [K, Cout], bias: [Cout] f32.
    residual may be (M, Cout) or already padded (Mp, Coutp).
    """
    M, K = patches.shape
    Kw, Cout = w_mat.shape
    assert K == Kw

    Coutp = _round_up(Cout, 128)          # lane-dense output stores
    tk, Kp = _pick_k_tile(K)
    tm, Mp = _pick_m_tile(M)
    k_steps = Kp // tk

    out_itemsize = jnp.dtype(out_dtype).itemsize
    res_itemsize = (jnp.dtype(residual.dtype).itemsize
                    if residual is not None else 0)

    def vmem_need(tm_):
        n = (2 * tm_ * tk * 2            # patches, double-buffered bf16
             + 2 * tk * Coutp * 2        # weights, double-buffered bf16
             + 2 * tm_ * Coutp * out_itemsize   # output, double-buffered
             + 2 * Coutp * 4)            # bias
        if residual is not None:
            n += 2 * tm_ * Coutp * res_itemsize
        if k_steps > 1:
            n += tm_ * Coutp * 4         # f32 accumulator scratch
        return n

    # Keep the working set under the v7x 64 MiB physical VMEM (with margin).
    while vmem_need(tm) > _VMEM_BUDGET and tm > 128:
        tm //= 2
        Mp = _round_up(M, tm)

    # bf16 operands for the MXU; accumulation stays f32 inside the kernel.
    patches = patches.astype(jnp.bfloat16)
    w_mat = w_mat.astype(jnp.bfloat16)
    if Mp != M or Kp != K:
        patches = jnp.pad(patches, ((0, Mp - M), (0, Kp - K)))
    if Kp != K or Coutp != Cout:
        w_mat = jnp.pad(w_mat, ((0, Kp - K), (0, Coutp - Cout)))
    bias2 = jnp.pad(bias.reshape(1, Cout).astype(jnp.float32),
                    ((0, 0), (0, Coutp - Cout)))

    args = [patches, w_mat, bias2]
    use_res = residual is not None

    if k_steps == 1:
        in_specs = [
            pl.BlockSpec((tm, tk), lambda i: (i, 0)),       # patches tile
            pl.BlockSpec((tk, Coutp), lambda i: (0, 0)),    # full-K weights
            pl.BlockSpec((1, Coutp), lambda i: (0, 0)),     # folded BN bias
        ]
        if use_res:
            args.append(_to_padded(residual, Mp, Coutp))
            in_specs.append(pl.BlockSpec((tm, Coutp), lambda i: (i, 0)))
        out_spec = pl.BlockSpec((tm, Coutp), lambda i: (i, 0))
        grid = (Mp // tm,)
        scratch = []
        dims = ("parallel",)
        kernel = _make_kernel_single(use_res, relu)
    else:
        in_specs = [
            pl.BlockSpec((tm, tk), lambda i, k: (i, k)),
            pl.BlockSpec((tk, Coutp), lambda i, k: (k, 0)),
            pl.BlockSpec((1, Coutp), lambda i, k: (0, 0)),
        ]
        if use_res:
            args.append(_to_padded(residual, Mp, Coutp))
            in_specs.append(pl.BlockSpec((tm, Coutp), lambda i, k: (i, 0)))
        out_spec = pl.BlockSpec((tm, Coutp), lambda i, k: (i, 0))
        grid = (Mp // tm, k_steps)
        scratch = [pltpu.VMEM((tm, Coutp), jnp.float32)]
        dims = ("parallel", "arbitrary")
        kernel = _make_kernel_kloop(use_res, relu)

    # Advisory cost estimate for XLA scheduling around the custom call.
    bytes_accessed = (patches.size * 2 + w_mat.size * 2 + bias2.size * 4
                      + Mp * Coutp * out_itemsize)
    if use_res:
        bytes_accessed += Mp * Coutp * res_itemsize
    cost = pl.CostEstimate(flops=int(2 * Mp * Kp * Coutp), transcendentals=0,
                           bytes_accessed=int(bytes_accessed))

    # Tight, honest VMEM limit (~2x need), capped well below v7x's 64 MiB.
    need = vmem_need(tm)
    vmem_limit = int(min(_VMEM_LIMIT_CAP, max(_VMEM_LIMIT_FLOOR, 2 * need)))

    out = pl.pallas_call(
        kernel,
        out_shape=jax.ShapeDtypeStruct((Mp, Coutp), out_dtype),
        grid_spec=pltpu.PrefetchScalarGridSpec(
            num_scalar_prefetch=0,
            grid=grid,
            in_specs=in_specs,
            out_specs=out_spec,
            scratch_shapes=scratch,
        ),
        compiler_params=pltpu.CompilerParams(
            dimension_semantics=dims,
            vmem_limit_bytes=vmem_limit),
        cost_estimate=cost,
    )(*args)

    if return_padded:
        return out
    return out[:M, :Cout]


# ----------------------------------------------------------------------------
# Plain-JAX glue: im2col, BN folding into weights/bias
# ----------------------------------------------------------------------------
def im2col(x_nhwc, kh, kw, stride, pad):
    N, H, W, C = x_nhwc.shape
    xp = jnp.pad(x_nhwc, ((0, 0), (pad, pad), (pad, pad), (0, 0)))
    Ho = (H + 2 * pad - kh) // stride + 1
    Wo = (W + 2 * pad - kw) // stride + 1
    cols = []
    for i in range(kh):
        for j in range(kw):
            cols.append(xp[:, i:i + stride * Ho:stride,
                           j:j + stride * Wo:stride, :])
    patches = jnp.concatenate(cols, axis=-1)  # [N, Ho, Wo, kh*kw*C]
    return patches.reshape(N * Ho * Wo, kh * kw * C), (N, Ho, Wo)


def prep_conv_bn(w_oihw, gamma, beta, mean, var, eps=1e-5):
    """Fold inference-mode BN into the conv: returns (bf16 [K,Cout] weight
    matrix matching im2col ordering, f32 bias)."""
    scale = gamma / jnp.sqrt(var + eps)
    bias = beta - mean * scale
    w_folded = w_oihw * scale[:, None, None, None]
    Cout, Cin, kh, kw = w_oihw.shape
    # OIHW -> HWIO -> [KH*KW*Cin, Cout] (matches im2col tap/channel order)
    w_mat = jnp.transpose(w_folded, (2, 3, 1, 0)).reshape(kh * kw * Cin, Cout)
    return w_mat.astype(jnp.bfloat16), bias.astype(jnp.float32)


def conv_bn(x_nhwc, w_oihw, bn_params, stride, relu, residual_2d=None,
            out_dtype=jnp.float32, return_padded=False):
    Cout, Cin, kh, kw = w_oihw.shape
    pad = (kh - 1) // 2
    w_mat, bias = prep_conv_bn(w_oihw, *bn_params)
    # Cast to bf16 BEFORE im2col so the 9x-inflated patch matrix is bf16.
    patches, (N, Ho, Wo) = im2col(x_nhwc.astype(jnp.bfloat16),
                                  kh, kw, stride, pad)
    out = fused_matmul_bn(patches, w_mat, bias, residual=residual_2d,
                          relu=relu, out_dtype=out_dtype,
                          return_padded=return_padded)
    if return_padded:
        return out, (N, Ho, Wo, Cout)
    return out.reshape(N, Ho, Wo, Cout)


# ----------------------------------------------------------------------------
# BasicBlock forward
# ----------------------------------------------------------------------------
def basic_block_forward(x_nchw, params, stride):
    x = jnp.transpose(x_nchw, (0, 2, 3, 1)).astype(jnp.float32)  # NCHW->NHWC

    # conv1 -> bn1 -> relu, stored in bf16 (halves writeback + im2col re-read)
    out1 = conv_bn(x, params["conv1_w"], params["bn1"], stride, relu=True,
                   out_dtype=jnp.bfloat16)
    N, Ho, Wo, planes = out1.shape

    # Shortcut path: keep the padded (Mp, Coutp) layout end-to-end and feed
    # it straight into conv2's epilogue (no slice + re-pad HBM round trips).
    if "sc_w" in params:
        res2d, _ = conv_bn(x, params["sc_w"], params["bn_sc"], stride,
                           relu=False, out_dtype=jnp.bfloat16,
                           return_padded=True)
    else:
        res2d = x.reshape(N * Ho * Wo, planes).astype(jnp.bfloat16)

    # conv2 -> bn2 -> (+ shortcut) -> relu, fused into one kernel epilogue.
    out = conv_bn(out1, params["conv2_w"], params["bn2"], 1, relu=True,
                  residual_2d=res2d, out_dtype=jnp.float32)
    return jnp.transpose(out, (0, 3, 1, 2))  # NHWC -> NCHW


# ----------------------------------------------------------------------------
# References for the correctness checks
# ----------------------------------------------------------------------------
def _conv_nhwc(x, w_hwio, stride, pad):
    return jax.lax.conv_general_dilated(
        x, w_hwio, (stride, stride), [(pad, pad), (pad, pad)],
        dimension_numbers=("NHWC", "HWIO", "NHWC"))


def basic_block_matched_ref(x_nchw, params, stride):
    """Same math as the Pallas path (folded BN, bf16-rounded operands and
    intermediates, f32 accumulation) built from lax.conv — tight-tolerance
    check of the kernel / im2col / layout logic."""
    def b16(v):
        return v.astype(jnp.bfloat16).astype(jnp.float32)

    x = jnp.transpose(x_nchw, (0, 2, 3, 1)).astype(jnp.float32)
    x_b = b16(x)

    def conv(inp, w_oihw, bn, s, pad):
        Cout, Cin, kh, kw = w_oihw.shape
        w_mat, bias = prep_conv_bn(w_oihw, *bn)
        w_hwio = w_mat.astype(jnp.float32).reshape(kh, kw, Cin, Cout)
        return _conv_nhwc(inp, w_hwio, s, pad) + bias

    out1 = b16(jax.nn.relu(conv(x_b, params["conv1_w"], params["bn1"],
                                stride, 1)))          # bf16 storage of out1
    if "sc_w" in params:
        sc = b16(conv(x_b, params["sc_w"], params["bn_sc"], stride, 0))
    else:
        sc = x_b                                      # bf16 residual
    o = jax.nn.relu(conv(out1, params["conv2_w"], params["bn2"], 1, 1) + sc)
    return jnp.transpose(o, (0, 3, 1, 2))


def basic_block_f32_ref(x_nchw, params, stride):
    """Straight port of the PyTorch module semantics (unfolded f32 BN) —
    loose-tolerance check (the Pallas path uses bf16 operands/intermediates)."""
    x = jnp.transpose(x_nchw, (0, 2, 3, 1))

    def conv(inp, w_oihw, s, pad):
        w_hwio = jnp.transpose(w_oihw, (2, 3, 1, 0))
        return _conv_nhwc(inp, w_hwio, s, pad)

    def bn(y, gamma, beta, mean, var, eps=1e-5):
        return (y - mean) / jnp.sqrt(var + eps) * gamma + beta

    o = jax.nn.relu(bn(conv(x, params["conv1_w"], stride, 1), *params["bn1"]))
    o = bn(conv(o, params["conv2_w"], 1, 1), *params["bn2"])
    if "sc_w" in params:
        sc = bn(conv(x, params["sc_w"], stride, 0), *params["bn_sc"])
    else:
        sc = x
    return jnp.transpose(jax.nn.relu(o + sc), (0, 3, 1, 2))


# ----------------------------------------------------------------------------
# Deterministic parameter init + run
# ----------------------------------------------------------------------------
def make_params(key, in_planes, planes, stride):
    ks = jax.random.split(key, 8)
    params = {
        "conv1_w": 0.1 * jax.random.normal(ks[0], (planes, in_planes, 3, 3),
                                           jnp.float32),
        "bn1": (1.0 + 0.05 * jax.random.normal(ks[1], (planes,)),    # gamma
                0.05 * jax.random.normal(ks[2], (planes,)),          # beta
                0.1 * jax.random.normal(ks[3], (planes,)),           # mean
                1.0 + 0.1 * jnp.abs(jax.random.normal(ks[4], (planes,)))),
        "conv2_w": 0.1 * jax.random.normal(ks[5], (planes, planes, 3, 3),
                                           jnp.float32),
        "bn2": (jnp.ones((planes,)), jnp.zeros((planes,)),
                0.1 * jnp.ones((planes,)), 1.2 * jnp.ones((planes,))),
    }
    if stride != 1 or in_planes != planes:
        params["sc_w"] = 0.1 * jax.random.normal(
            ks[6], (planes, in_planes, 1, 1), jnp.float32)
        params["bn_sc"] = (jnp.ones((planes,)), jnp.zeros((planes,)),
                           jnp.zeros((planes,)), jnp.ones((planes,)))
    return params


if __name__ == "__main__":
    key = jax.random.PRNGKey(0)

    configs = [
        # (batch, in_planes, planes, spatial, stride)
        (2, 4, 8, 16, 2),   # downsampling block with 1x1-conv shortcut
        (2, 8, 8, 8, 1),    # identity-shortcut block
    ]
    for batch, in_planes, planes, spatial, stride in configs:
        k_x, k_p, key = jax.random.split(key, 3)
        x = jax.random.normal(k_x, (batch, in_planes, spatial, spatial),
                              jnp.float32)
        params = make_params(k_p, in_planes, planes, stride)

        out = jax.block_until_ready(basic_block_forward(x, params, stride))
        assert out.shape == (batch, planes, spatial // stride,
                             spatial // stride)

        # Tight check against a reference that mirrors the kernel's precision
        # (bf16 operands + bf16 intermediate storage, f32 accumulation).
        matched = jax.block_until_ready(
            basic_block_matched_ref(x, params, stride))
        np.testing.assert_allclose(np.asarray(out), np.asarray(matched),
                                   rtol=1e-3, atol=1e-3)

        # Loose sanity check against the pure-f32 module semantics
        # (bf16 MXU operands / intermediates => relaxed tolerance).
        ref = jax.block_until_ready(basic_block_f32_ref(x, params, stride))
        np.testing.assert_allclose(np.asarray(out), np.asarray(ref),
                                   rtol=0.1, atol=0.1)

    print("KERNEL_OK")
</pallas_src>

<mosaic_0001>
module attributes {stable_mosaic.version = 11 : i64} {
  func.func @kernel(%arg0: i32, %arg1: memref<64x36xbf16, #tpu.memory_space<vmem>>, %arg2: memref<36x128xbf16, #tpu.memory_space<vmem>>, %arg3: memref<1x128xf32, #tpu.memory_space<vmem>>, %arg4: memref<64x128xbf16, #tpu.memory_space<vmem>>) attributes {dimension_semantics = [#tpu.dimension_semantics<parallel>], iteration_bounds = array<i64: 2>, scalar_prefetch = 0 : i64, scratch_operands = 0 : i64, tpu.core_type = #tpu.core_type<tc>, window_params = [{transform_indices = @transform_0, window_bounds = array<i64: 64, 36>}, {pipeline_mode = #tpu.pipeline_mode<synchronous>, transform_indices = @transform_1, window_bounds = array<i64: 36, 128>}, {pipeline_mode = #tpu.pipeline_mode<synchronous>, transform_indices = @transform_2, window_bounds = array<i64: 1, 128>}, {transform_indices = @transform_3, window_bounds = array<i64: 64, 128>}]} {
    %c0 = arith.constant 0 : index
    %c0_0 = arith.constant 0 : index
    %0 = vector.load %arg1[%c0, %c0_0] : memref<64x36xbf16, #tpu.memory_space<vmem>>, vector<64x36xbf16>
    %c0_1 = arith.constant 0 : index
    %c0_2 = arith.constant 0 : index
    %1 = vector.load %arg2[%c0_1, %c0_2] : memref<36x128xbf16, #tpu.memory_space<vmem>>, vector<36x128xbf16>
    %cst = arith.constant dense<0.000000e+00> : vector<64x128xf32>
    %2 = tpu.matmul %0, %1, %cst {dimension_numbers = #tpu.dot_dimension_numbers<[1], [0], [0], [1], [0, 0, 1, 1], [], []>} : vector<64x36xbf16>, vector<36x128xbf16>, vector<64x128xf32> -> vector<64x128xf32>
    %c0_3 = arith.constant 0 : index
    %c0_4 = arith.constant 0 : index
    %3 = vector.load %arg3[%c0_3, %c0_4] : memref<1x128xf32, #tpu.memory_space<vmem>>, vector<1x128xf32>
    %4 = vector.broadcast %3 : vector<1x128xf32> to vector<64x128xf32>
    %5 = arith.addf %2, %4 : vector<64x128xf32>
    %cst_5 = arith.constant 0.000000e+00 : f32
    %6 = vector.broadcast %cst_5 : f32 to vector<64x128xf32>
    %7 = arith.maximumf %5, %6 : vector<64x128xf32>
    %8 = arith.truncf %7 : vector<64x128xf32> to vector<64x128xbf16>
    %c0_6 = arith.constant 0 : index
    %c0_7 = arith.constant 0 : index
    %9 = vector.load %arg4[%c0_6, %c0_7] : memref<64x128xbf16, #tpu.memory_space<vmem>>, vector<64x128xbf16>
    tpu.vector_store %arg4[%c0_6, %c0_7], %8 {strides = array<i32>} : memref<64x128xbf16, #tpu.memory_space<vmem>>, vector<64x128xbf16>,
    return
  }
  func.func @transform_0(%arg0: i32) -> (i32, i32) {
    %c0_i32 = arith.constant 0 : i32
    %c0_i32_0 = arith.constant 0 : i32
    return %arg0, %c0_i32 : i32, i32
  }
  func.func @transform_1(%arg0: i32) -> (i32, i32) {
    %c0_i32 = arith.constant 0 : i32
    %c0_i32_0 = arith.constant 0 : i32
    %c0_i32_1 = arith.constant 0 : i32
    return %c0_i32, %c0_i32_0 : i32, i32
  }
  func.func @transform_2(%arg0: i32) -> (i32, i32) {
    %c0_i32 = arith.constant 0 : i32
    %c0_i32_0 = arith.constant 0 : i32
    %c0_i32_1 = arith.constant 0 : i32
    return %c0_i32, %c0_i32_0 : i32, i32
  }
  func.func @transform_3(%arg0: i32) -> (i32, i32) {
    %c0_i32 = arith.constant 0 : i32
    %c0_i32_0 = arith.constant 0 : i32
    return %arg0, %c0_i32 : i32, i32
  }
}

</mosaic_0001>

<bundles_post_ra>
// kernel: tpu_custom_call.1
= control target key start
LH: loop header
LB: loop body
LE: loop exit
PB: predicated region body
PF: predicated region fallthrough
CT: control target
= control target key end

     0   :  { %8 = vsyncpa [#allocation3], 0  ;;  %s780_s0 = inlined_call_operand.vmem [shape: bf16[128,36], index: 0, kind: input, shape index: {}]   ;;  %s781_s1 = inlined_call_operand.vmem [shape: bf16[36,128], index: 1, kind: input, shape index: {}]   ;;  %s782_s2 = inlined_call_operand.vmem [shape: f32[1,128], index: 2, kind: input, shape index: {}]   ;;  %s783_s3 = inlined_call_operand.hbm [shape: bf16[128,128], index: 3, kind: output, shape index: {}]  }
   0x1   :  { %10 = vsyncpa [#allocation3 + $0x1], 0  ;;  %s662_s12 = smov 0   ;;  %s664_s13 = smov 0  }
   0x2   :  { %s666_s14 = smov 0   ;;  %s668_s15 = smov 0  }
   0x3 LB: > { %s683_s16 = sadd.s32 4294967295, %s637_s15   ;;  %s434_s17 = sadd.s32 4294967294, %s637_s15   ;;  %s637_s15 = sphi %s668_s15, %s789_s15   ;;  %s633_s14 = sphi %s666_s14, %s788_s14   ;;  %s629_s13 = sphi %s664_s13, %s787_s13   ;;  %s625_s12 = sphi %s662_s12, %s786_s12  }
   0x4   : > { %s687_s18 = sadd.s32 1, %s637_s15   ;;  %s91_s19 = sadd.s32 1, %s633_s14 }
   0x5   : > { %s88_s20 = ssub.s32 %s637_s15, %s687_s18  ;;  %p101_p0 = scmp.ne.s32.totalorder %s633_s14, %s629_s13 }
   0x6   : > { %p89_p1 = scmp.eq.s32.totalorder %s88_s20, 0  ;;  %p102_p2 = scmp.eq.s32.totalorder %s683_s16, 1 }
   0x7   : > { %p107_p3 = scmp.ne.s32.totalorder %s629_s13, %s625_s12  ;;  %p108_p4 = scmp.eq.s32.totalorder %s434_s17, 1 }
   0x8   : > { %s698_s21 = scalar_select %p89_p1, %s633_s14, %s91_s19  }
   0x9   : > { %p700_p5 = por %p102_p2, %p101_p0  ;;  %p704_p6 = por %p108_p4, %p107_p3 }
   0xa   : > { %p437_p7 = scmp.ge.s32.totalorder %s637_s15, 1  ;;  %p141_p8 = scmp.lt.s32.totalorder %s637_s15, 3 }
   0xc   : > { %p142_p9 = pnand %p437_p7, %p141_p8 }
   0xd   : > { %v568_v0 = vld [vmem:[%s781_s1] sm:$0xff] (!%p142_p9)   ;;  %v569_v1 = vld [vmem:[%s781_s1 + $0x8] sm:$0xff] (!%p142_p9)   ;;  %s439_s28 = sshll.u32 (!%p142_p9), %s683_s16, 3  ;;  %v570_v2 = vld [vmem:[%s781_s1 + $0x10] ss:$0 sps:$4 sm:$0x33] (!%p142_p9)  }
   0xe   : > { %145 = sbr.rel (%p142_p9) target bundleno = 262 (0x106), region = 32  ;;  %505 = vmatprep.subr.bf16.mxu0 (!%p142_p9), %v568_v0  ;;  %519 = vmatprep.subr.bf16.mxu1 (!%p142_p9), %v568_v0  ;;  %p166_p10 = scmp.lt.s32.totalorder (!%p142_p9), %s439_s28, 15  ;;  %vm241_vm0 = vcmask (!%p142_p9), 1041408   ;;  %vm228_vm1 = vcmask (!%p142_p9), 293888   ;;  %v441_v8 = vld [vmem:[%s782_s2] ss:$0 sm:$0xff] (!%p142_p9) }
   0xf   : > { %506 = vmatpush3.bf16.msra.mxu0 (!%p142_p9), %v568_v0  ;;  %522 = vmatpush3.bf16.msra.mxu1 (!%p142_p9), %v568_v0  ;;  %v243_v3 = vsel (!%p142_p9), %vm241_vm0, %v570_v2, 0  ;;  %s162_s8 = sand.u32 (!%p142_p9), 1, %s629_s13   ;;  %s474_s20 = sshll.u32 (!%p142_p9), %s683_s16, 9 }
  0x10   : > { %507 = vmatprep.subr.bf16.mxu0 (!%p142_p9), %v569_v1  ;;  %520 = vmatprep.subr.bf16.mxu1 (!%p142_p9), %v569_v1  ;;  %s438_s11 = sshll.u32 (!%p142_p9), %s162_s8, 5  ;;  %s735_s16 = scalar_lea.hbm (!%p142_p9), %s783_s3, %s474_s20 }
  0x11   : > { %s164_s17 = scalar_lea.vmem (!%p142_p9), [#allocation2], %s438_s11  ;;  %s739_s26 = scalar_lea.sflag (!%p142_p9), [#allocation3], %s162_s8 }
  0x12   : > { %s372_s19 = sshll.u32 (!%p142_p9), %s164_s17, 4  ;;  %s730_s19 = int_to_ptr.vmem [resolvable:$true] %s372_s19 }
  0x13   : > { %508 = vmatpush3.bf16.msra.mxu0 (!%p142_p9), %v569_v1  ;;  %523 = vmatpush3.bf16.msra.mxu1 (!%p142_p9), %v569_v1  ;;  %s575_s27 = scalar_lea.vmem (!%p142_p9), %s730_s19, 512 }
  0x14   : > { %525 = vmatprep.subr.msk.bf16.mxu0 (!%p142_p9), %vm241_vm0, %v570_v2  ;;  %526 = vmatprep.subr.msk.bf16.mxu1 (!%p142_p9), %vm241_vm0, %v570_v2  ;;  %p576_p11 = scmp.ne.s32.totalorder (!%p142_p9), %s730_s19, %s575_s27 }
  0x15   : > { %s791_s28 = smov (!%p166_p10, %s439_s28), 15 }
  0x16   : > { %s440_s4 = sshll.u32 %s791_s28, 2  ;;  %p577_p12 = pnand %p576_p11, %p700_p5 }
  0x17   : > { %s169_s7 = scalar_lea.vmem %s780_s0, %s440_s4  ;;  %510 = vmatpush3.bf16.msra.mxu0 %v243_v3  ;;  %524 = vmatpush3.bf16.msra.mxu1 %v243_v3  ;;  %s639_s28 = smov [#allocation2]  }
  0x18   : > { %v571_v4 = vld [vmem:[%s169_s7] sm:$0xff]   ;;  %v572_v5 = vld [vmem:[%s169_s7 + $0x10] sm:$0xff]   ;;  %v573_v6 = vld [vmem:[%s169_s7 + $0x8] sm:$0xff]   ;;  %p578_p13 = pneg %p577_p12  ;;  %s579_s29 = sshll.u32 %s639_s28, 4  ;;  %s580_s29 = int_to_ptr.vmem [resolvable:$false] %s579_s29 }
  0x19   : > { %511 = vmatprep.mubr.msk.bf16.mxu0 %vm228_vm1, %v571_v4  ;;  %v574_v7 = vld [vmem:[%s169_s7 + $0x18] sm:$0xff]   ;;  %515 = vmatprep.mubr.msk.bf16.mxu1 %vm228_vm1, %v572_v5  ;;  %s581_s30 = scalar_lea.vmem %s580_s29, 1024  ;;  %p582_p0 = scmp.lt.s32.totalorder %s730_s19, %s580_s29 }
  0x1a   : > { %512 = vmatmul.mubr.msk.bf16.vlgmr.msra.gmra.mrb[0].mxu0 %vm228_vm1, %v573_v6  ;;  %516 = vmatmul.mubr.msk.bf16.vlgmr.msra.gmra.mrb[0].mxu1 %vm228_vm1, %v574_v7  ;;  %p583_p1 = scmp.lt.s32.totalorder %s581_s30, %s575_s27 }
  0x1c   : > { %p584_p2 = por %p583_p1, %p582_p0 }
  0x1e   : > { %p585_p3 = pnand %p584_p2, %p578_p13 }
  0xed   : > { %v513_v9 = vpop.f32.mrb[0].mxu0  ;;  %v517_v10 = vpop.f32.mrb[0].mxu1 }
  0xee   : > { %v288_v11 = vadd.f32 %v513_v9, %v441_v8  ;;  %v304_v12 = vadd.f32 %v517_v10, %v441_v8  ;;  %v279_v13 = vpop.f32.mrb[1].mxu0  ;;  %v295_v14 = vpop.f32.mrb[1].mxu1 }
  0xef   : > { %v280_v15 = vadd.f32 %v441_v8, %v279_v13  ;;  %v296_v16 = vadd.f32 %v441_v8, %v295_v14  ;;  %v514_v17 = vpop.f32.mrb[2].mxu0  ;;  %v518_v18 = vpop.f32.mrb[2].mxu1 }
  0xf0   : > { %v291_v19 = vadd.f32 %v514_v17, %v441_v8  ;;  %v307_v20 = vadd.f32 %v518_v18, %v441_v8  ;;  %v282_v21 = vpop.f32.mrb[3].mxu0  ;;  %v298_v22 = vpop.f32.mrb[3].mxu1  ;;  %v312_v25 = vmax.f32 %v288_v11, 0.0  ;;  %v316_v26 = vmax.f32 %v304_v12, 0.0 }
  0xf1   : > { %v283_v23 = vadd.f32 %v441_v8, %v282_v21  ;;  %v299_v24 = vadd.f32 %v441_v8, %v298_v22  ;;  %v310_v29 = vmax.f32 %v280_v15, 0.0  ;;  %v314_v30 = vmax.f32 %v296_v16, 0.0 }
  0xf2   : > { %v313_v27 = vmax.f32 %v291_v19, 0.0  ;;  %v317_v28 = vmax.f32 %v307_v20, 0.0 }
  0xf3   : > { %v311_v31 = vmax.f32 %v283_v23, 0.0  ;;  %v315_v32 = vmax.f32 %v299_v24, 0.0 }
  0xf4   : > { %v483_v33 = vpack.c.bf16 %v313_v27, %v312_v25  ;;  %v493_v34 = vpack.c.bf16 %v317_v28, %v316_v26 }
  0xf5   : > { %v478_v35 = vpack.c.bf16 %v311_v31, %v310_v29  ;;  %v488_v36 = vpack.c.bf16 %v315_v32, %v314_v30 }
  0xf6   : > { %495 = vst [vmem:[%s164_s17 + $0x8] sm:$0xff] %v483_v33   ;;  %497 = vst [vmem:[%s164_s17 + $0x18] sm:$0xff] %v493_v34  }
  0xf7   : > { %479 = vst [vmem:[%s164_s17] sm:$0xff] %v478_v35   ;;  %496 = vst [vmem:[%s164_s17 + $0x10] sm:$0xff] %v488_v36  }
  0xf8   : > { %588 = shalt.err (!%p585_p3)
}
  0xf9   : > { %s589_s4 = scalar_lea.hbm %s735_s16, 512  ;;  %s593_s7 = scalar_lea.hbm %s783_s3, 1024 }
  0xfa   : > { %p590_p4 = scmp.ne.s32.totalorder %s735_s16, %s589_s4  ;;  %p594_p9 = scmp.lt.u32.totalorder %s735_s16, %s783_s3 }
  0xfb   : > { %p595_p10 = scmp.lt.u32.totalorder %s593_s7, %s589_s4  ;;  %p597_p12 = scmp.lt.u32.totalorder %s589_s4, %s735_s16 }
  0xfc   : > { %p591_p7 = pnand %p590_p4, %p700_p5 }
  0xfd   : > { %p596_p11 = por %p595_p10, %p594_p9 }
  0xfe   : > { %p592_p8 = pneg %p591_p7 }
  0xff   : > { %p598_p13 = por %p597_p12, %p596_p11 }
 0x101   : > { %p599_p0 = pnand %p598_p13, %p592_p8 }
 0x103   : > { %602 = shalt.err (!%p599_p0)
}
 0x104   : > { %s640_s10 = smov 64   ;;  %s641_s11 = smov 4  }
 0x105   : > { %527 = dma.vmem_to_hbm [thread:$0]  (%p700_p5), %s730_s19, 512, %s735_s16, %s739_s26, %s640_s10, %s640_s10, %s641_s11  }
 0x106 PF: > { %p533_p1 = scmp.ge.s32.totalorder %s637_s15, 2  ;;  %s387_s17 = sand.u32 1, %s625_s12  }
 0x107   : > { %s388_s20 = scalar_lea.sflag [#allocation3], %s387_s17 }
 0x108   : > { %p530_p2 = pnand %p533_p1, %p704_p6 }
 0x10a   : > { %620 = dma.done.wait (!%p530_p2), %s388_s20, 512  }
 0x10b   : > { %622 = vsyncadd (!%p530_p2), %s388_s20, 4294966784  ;;  %p13_p3 = scmp.ge.s32.totalorder %s687_s18, 4   ;;  %s786_s12 = smov %s629_s13 }
 0x10c   : > { %s787_s13 = smov %s633_s14  ;;  %s788_s14 = smov %s698_s21 }
 0x10d   : > { %s789_s15 = smov %s687_s18  ;;  %15 = sbr.rel (!%p13_p3) target bundleno = 3 (0x3), region = 67 }
 0x114   :  { %393 = vsyncpa [#allocation3], 1 }
 0x115   :  { %395 = vsyncpa [#allocation3 + $0x1], 1 }

</bundles_post_ra>
